<compile_context>
chip_gen: v7x
topology: tpu7x:2x2x1
jax: 0.10.0
libtpu: 0.0.40
codegen_flags: <defaults>
</compile_context>

<pallas_src>
import math
import functools

import jax
import jax.numpy as jnp
from jax import lax
from jax.experimental import pallas as pl
from jax.experimental.pallas import tpu as pltpu


def make_positional_encoding(d_model, max_len=5000, dtype=jnp.float32):
    """Deterministically build the sin/cos table, same math as the torch __init__."""
    position = jnp.arange(max_len, dtype=jnp.float32)[:, None]                      # (max_len, 1)
    div_term = jnp.exp(jnp.arange(0, d_model, 2, dtype=jnp.float32)
                       * (-math.log(10000.0) / d_model))                            # (d_model/2,)
    angles = position * div_term                                                    # (max_len, d_model/2)
    pe = jnp.zeros((max_len, d_model), jnp.float32)
    pe = pe.at[:, 0::2].set(jnp.sin(angles))
    pe = pe.at[:, 1::2].set(jnp.cos(angles))
    return pe[:, None, :].astype(dtype)                                             # (max_len, 1, d_model)


# ---------------- dropout bits: portable counter-based hash (no pltpu.prng_*) ----------------

def _splitmix32(v):
    """splitmix32-style mixer on uint32 (wraps mod 2**32)."""
    v = v ^ (v >> 16)
    v = v * jnp.uint32(0x7FEB352D)
    v = v ^ (v >> 15)
    v = v * jnp.uint32(0x846CA68B)
    v = v ^ (v >> 16)
    return v


def _dropout_keep_ref(n_rows, n_cols, seed, threshold):
    """Pure-JAX mirror of the in-kernel keep mask (same integer ops -> same bits)."""
    row = lax.broadcasted_iota(jnp.int32, (n_rows, n_cols), 0)
    col = lax.broadcasted_iota(jnp.int32, (n_rows, n_cols), 1)
    ctr = (row * n_cols + col).astype(jnp.uint32)
    bits = _splitmix32(ctr ^ (jnp.uint32(seed) * jnp.uint32(0x9E3779B9)))
    return bits >= jnp.uint32(threshold)


# ---------------- Pallas kernels ----------------

def _pe_add_kernel(x_ref, pe_ref, o_ref, *, batch):
    # eval-mode forward: x + pe (dropout is identity in eval).
    # x_ref/o_ref: (tS, B*D); pe_ref: (tS, D).  Batch broadcast = lane concatenation
    # of the small pe tile in VMEM (no HBM-side pe expansion, no in-kernel reshapes).
    pe = pe_ref[...]
    if batch > 1:
        pe = jnp.concatenate([pe] * batch, axis=-1)          # (tS, D) -> (tS, B*D)
    o_ref[...] = (x_ref[...] + pe).astype(o_ref.dtype)


def _pe_add_dropout_kernel(seed_ref, x_ref, pe_ref, o_ref, *, batch, threshold, inv_keep):
    # training-mode forward: dropout(x + pe), inverted-dropout scaling 1/(1-p).
    pe = pe_ref[...]
    if batch > 1:
        pe = jnp.concatenate([pe] * batch, axis=-1)
    y = x_ref[...].astype(jnp.float32) + pe.astype(jnp.float32)

    # Random bits generated directly in the block's shape from GLOBAL element indices,
    # so every tile gets a different mask and the mask is independent of the tiling.
    blk_rows, n_cols = x_ref.shape
    row = lax.broadcasted_iota(jnp.int32, (blk_rows, n_cols), 0) + pl.program_id(0) * blk_rows
    col = lax.broadcasted_iota(jnp.int32, (blk_rows, n_cols), 1)
    ctr = (row * n_cols + col).astype(jnp.uint32)
    bits = _splitmix32(ctr ^ (seed_ref[0].astype(jnp.uint32) * jnp.uint32(0x9E3779B9)))
    keep = bits >= jnp.uint32(threshold)                      # integer compare: P(keep)=1-p

    o_ref[...] = jnp.where(keep, y * jnp.float32(inv_keep),
                           jnp.zeros_like(y)).astype(o_ref.dtype)


# ---------------- wrapper ----------------

def _pick_block_rows(n_rows, row_bytes, target_bytes):
    """Largest row-block that divides n_rows, is sublane-full (multiple of 8), and keeps
    one block under ~target_bytes so double-buffering fits the default scoped-VMEM limit
    on every TPU generation (v5e 16 MiB ... v7x 32/64 MiB)."""
    if n_rows * row_bytes <= target_bytes:
        return n_rows
    cap = max(8, (target_bytes // row_bytes) // 8 * 8)
    for t in range(min(cap, n_rows), 7, -1):
        if t % 8 == 0 and n_rows % t == 0:
            return t
    return n_rows  # no nice divisor: fall back to a single block (still correct)


def positional_encoding(x, pe, *, p=0.1, training=False, seed=0,
                        block_bytes=2 * 1024 * 1024, in_place=False):
    """Forward pass of PositionalEncoding. x: (S, B, D); pe: (max_len, 1, D) or (max_len, D)."""
    S, B, D = x.shape
    pe2 = pe.reshape(pe.shape[0], D) if pe.ndim == 3 else pe        # free squeeze, no data copy
    max_len = pe2.shape[0]
    assert S <= max_len and pe2.shape[1] == D

    x2 = x.reshape(S, B * D)                                        # free, contiguous reshape
    tS = _pick_block_rows(S, B * D * x.dtype.itemsize, block_bytes)
    grid = (S // tS,)

    # index_maps take (*grid_ids, *scalar_prefetch_refs); absorb the latter with *_
    x_spec = pl.BlockSpec((tS, B * D), lambda i, *_: (i, 0))
    pe_spec = pl.BlockSpec((tS, D), lambda i, *_: (i, 0))           # reads rows of the FULL table
    out_spec = pl.BlockSpec((tS, B * D), lambda i, *_: (i, 0))
    out_shape = jax.ShapeDtypeStruct((S, B * D), x.dtype)
    cparams = pltpu.CompilerParams(dimension_semantics=("parallel",))  # megacore on v7x

    if (not training) or p <= 0.0:
        out2 = pl.pallas_call(
            functools.partial(_pe_add_kernel, batch=B),
            out_shape=out_shape,
            grid_spec=pltpu.PrefetchScalarGridSpec(
                num_scalar_prefetch=0, grid=grid,
                in_specs=[x_spec, pe_spec], out_specs=out_spec),
            compiler_params=cparams,
            input_output_aliases=({0: 0} if in_place else {}),
        )(x2, pe2)
        return out2.reshape(S, B, D)

    if p >= 1.0:  # degenerate: everything dropped
        return jnp.zeros_like(x)

    threshold = min(max(int(round(p * 4294967296.0)), 0), 4294967295)
    inv_keep = 1.0 / (1.0 - p)
    seed_arr = jnp.asarray([seed], dtype=jnp.int32)

    out2 = pl.pallas_call(
        functools.partial(_pe_add_dropout_kernel, batch=B,
                          threshold=threshold, inv_keep=inv_keep),
        out_shape=out_shape,
        grid_spec=pltpu.PrefetchScalarGridSpec(
            num_scalar_prefetch=1,    # seed lives in SMEM
            grid=grid,
            in_specs=[x_spec, pe_spec], out_specs=out_spec),
        compiler_params=cparams,
        input_output_aliases=({1: 0} if in_place else {}),
    )(seed_arr, x2, pe2)
    return out2.reshape(S, B, D)


if __name__ == "__main__":
    S, B, D = 16, 2, 32          # seq=16, batch=2, d_model=32
    max_len = 64
    p = 0.1
    seed = 42

    key = jax.random.PRNGKey(0)
    x = jax.random.normal(key, (S, B, D), dtype=jnp.float32)
    pe = make_positional_encoding(D, max_len=max_len)
    ref = x + pe[:S]                                     # pure-JAX reference (eval mode)

    # eval mode (dropout identity)
    out_eval = positional_encoding(x, pe, p=p, training=False)
    jax.block_until_ready(out_eval)
    assert out_eval.shape == (S, B, D) and out_eval.dtype == x.dtype
    assert jnp.allclose(out_eval, ref, atol=1e-6), "eval-mode mismatch"

    # eval mode, forced multi-tile grid (exercises the row tiling / index_maps)
    out_eval_tiled = positional_encoding(x, pe, p=p, training=False, block_bytes=1024)
    jax.block_until_ready(out_eval_tiled)
    assert jnp.allclose(out_eval_tiled, ref, atol=1e-6), "tiled eval-mode mismatch"

    # training mode (dropout active) — check against a pure-JAX mirror of the mask
    out_train = positional_encoding(x, pe, p=p, training=True, seed=seed)
    jax.block_until_ready(out_train)
    assert out_train.shape == (S, B, D) and out_train.dtype == x.dtype
    threshold = min(max(int(round(p * 4294967296.0)), 0), 4294967295)
    keep = _dropout_keep_ref(S, B * D, seed, threshold)
    expected = jnp.where(keep, ref.reshape(S, B * D) * jnp.float32(1.0 / (1.0 - p)),
                         0.0).reshape(S, B, D)
    assert jnp.allclose(out_train, expected, atol=1e-5), "train-mode mismatch"

    # dropout mask must be invariant to the tile size (global counters)
    out_train_tiled = positional_encoding(x, pe, p=p, training=True, seed=seed,
                                          block_bytes=1024)
    jax.block_until_ready(out_train_tiled)
    assert jnp.allclose(out_train_tiled, out_train, atol=1e-6), "tiling changed dropout mask"

    print("KERNEL_OK")
</pallas_src>

<mosaic_0001>
module attributes {stable_mosaic.version = 11 : i64} {
  func.func @_pe_add_kernel(%arg0: i32, %arg1: memref<16x64xf32, #tpu.memory_space<vmem>>, %arg2: memref<16x32xf32, #tpu.memory_space<vmem>>, %arg3: memref<16x64xf32, #tpu.memory_space<vmem>>) attributes {dimension_semantics = [#tpu.dimension_semantics<parallel>], iteration_bounds = array<i64: 1>, scalar_prefetch = 0 : i64, scratch_operands = 0 : i64, tpu.core_type = #tpu.core_type<tc>, window_params = [{transform_indices = @transform_0, window_bounds = array<i64: 16, 64>}, {transform_indices = @transform_1, window_bounds = array<i64: 16, 32>}, {transform_indices = @transform_2, window_bounds = array<i64: 16, 64>}]} {
    %c0 = arith.constant 0 : index
    %c0_0 = arith.constant 0 : index
    %0 = vector.load %arg2[%c0, %c0_0] : memref<16x32xf32, #tpu.memory_space<vmem>>, vector<16x32xf32>
    %1 = tpu.concatenate %0, %0 in 1 : vector<16x32xf32>, vector<16x32xf32> -> vector<16x64xf32>
    %c0_1 = arith.constant 0 : index
    %c0_2 = arith.constant 0 : index
    %2 = vector.load %arg1[%c0_1, %c0_2] : memref<16x64xf32, #tpu.memory_space<vmem>>, vector<16x64xf32>
    %3 = arith.addf %2, %1 : vector<16x64xf32>
    %c0_3 = arith.constant 0 : index
    %c0_4 = arith.constant 0 : index
    %4 = vector.load %arg3[%c0_3, %c0_4] : memref<16x64xf32, #tpu.memory_space<vmem>>, vector<16x64xf32>
    tpu.vector_store %arg3[%c0_3, %c0_4], %3 {strides = array<i32>} : memref<16x64xf32, #tpu.memory_space<vmem>>, vector<16x64xf32>,
    return
  }
  func.func @transform_0(%arg0: i32) -> (i32, i32) {
    %c0_i32 = arith.constant 0 : i32
    %c0_i32_0 = arith.constant 0 : i32
    return %arg0, %c0_i32 : i32, i32
  }
  func.func @transform_1(%arg0: i32) -> (i32, i32) {
    %c0_i32 = arith.constant 0 : i32
    %c0_i32_0 = arith.constant 0 : i32
    return %arg0, %c0_i32 : i32, i32
  }
  func.func @transform_2(%arg0: i32) -> (i32, i32) {
    %c0_i32 = arith.constant 0 : i32
    %c0_i32_0 = arith.constant 0 : i32
    return %arg0, %c0_i32 : i32, i32
  }
}

</mosaic_0001>

<bundles_post_ra>
// kernel: tpu_custom_call.1
= control target key start
LH: loop header
LB: loop body
LE: loop exit
PB: predicated region body
PF: predicated region fallthrough
CT: control target
= control target key end

     0   :  { %s76_s11 = smov 32   ;;  %s119_s0 = inlined_call_operand.vmem [shape: f32[16,64], index: 0, kind: input, shape index: {}]   ;;  %s120_s1 = inlined_call_operand.vmem [shape: f32[64,32], index: 1, kind: input, shape index: {}]   ;;  %s121_s2 = inlined_call_operand.hbm [shape: f32[16,64], index: 2, kind: output, shape index: {}]  }
   0x1   :  { %v12_v0 = vld [vmem:[%s120_s1] sm:$0xff] }
   0x2   :  { %16 = vrot.lane.b32.xlu0 %v12_v0, %s76_s11 }
   0x3   :  { %7 = vsyncpa [#allocation3], 0  ;;  %v13_v1 = vld [vmem:[%s120_s1 + $0x8] sm:$0xff]  ;;  %vm22_vm0 = vcmask 261120   ;;  %v25_v2 = vld [vmem:[%s119_s0] sm:$0xff]  ;;  %vm29_vm1 = vcmask 523264  }
   0x4   :  { %v26_v6 = vld [vmem:[%s119_s0 + $0x8] sm:$0xff]  ;;  %s77_s18 = smov [#allocation2]  }
   0x5   :  { %s37_s19 = sshll.u32 %s77_s18, 4  ;;  %s38_s19 = int_to_ptr.vmem [resolvable:$true] %s37_s19 }
   0x6   :  { %18 = vrot.lane.b32.xlu0 %v13_v1, %s76_s11  ;;  %s52_s1 = scalar_lea.vmem %s38_s19, 256  ;;  %p57_p1 = scmp.lt.s32.totalorder %s38_s19, %s38_s19 }
   0x7   :  { %p53_p0 = scmp.ne.s32.totalorder %s38_s19, %s52_s1  ;;  %p58_p2 = scmp.lt.s32.totalorder %s52_s1, %s52_s1 }
   0x9   :  { %p59_p3 = por %p58_p2, %p57_p1 }
   0xb   :  { %p60_p4 = pnand %p59_p3, %p53_p0 }
  0x74   :  { %v17_v3 = vpop.permute.xlu0 %16 }
  0x75   :  { %v23_v4 = vsel %vm22_vm0, %v12_v0, %v17_v3 }
  0x76   :  { %v27_v5 = vadd.f32 %v25_v2, %v23_v4 }
  0x78   :  { %30 = vst.msk [vmem:[#allocation2] sm:$0xff] %vm29_vm1, %v27_v5  ;;  %v19_v7 = vpop.permute.xlu0 %18 }
  0x79   :  { %v24_v8 = vsel %vm22_vm0, %v13_v1, %v19_v7 }
  0x7a   :  { %v28_v9 = vadd.f32 %v26_v6, %v24_v8 }
  0x7c   :  { %31 = vst.msk [vmem:[#allocation2 + $0x8] sm:$0xff] %vm29_vm1, %v28_v9 }
  0x7d   :  { %63 = shalt.err (!%p60_p4)
}
  0x7e   :  { %s64_s22 = scalar_lea.hbm %s121_s2, 256 }
  0x7f   :  { %p65_p5 = scmp.ne.s32.totalorder %s121_s2, %s64_s22  ;;  %p68_p6 = scmp.lt.u32.totalorder %s64_s22, %s121_s2 }
  0x81   :  { %p70_p7 = pnand %p68_p6, %p65_p5 }
  0x83   :  { %73 = shalt.err (!%p70_p7)
}
  0x84   :  { %s78_s26 = smov 128   ;;  %s79_s27 = smov 8  }
  0x85   :  { %43 = dma.vmem_to_hbm [thread:$0]  %s38_s19, 256, %s121_s2, [#allocation3], %s78_s26, %s78_s26, %s79_s27  }
  0x86   :  { %74 = dma.done.wait [#allocation3], 256  }
  0x87   :  { %75 = vsyncadd [#allocation3], 4294967040 }
  0x88   :  { %47 = vsyncpa [#allocation3], 1 }

</bundles_post_ra>
